<compile_context>
chip_gen: v7x
topology: tpu7x:2x2x1
jax: 0.10.0
libtpu: 0.0.40
codegen_flags: <defaults>
</compile_context>

<pallas_src>
import math

import jax
import jax.numpy as jnp
from jax.experimental import pallas as pl
from jax.experimental.pallas import tpu as pltpu


def _fm_kernel(hu_ref, const_ref, out_ref):
    # Streamed [TB, Dp] tile of hu; const_ref is resident [2, Dp]:
    #   row 0 = s_const, row 1 = c_const = 0.5*(s^2 - ss).
    hu = hu_ref[...]
    s = const_ref[0:1, :]
    c = const_ref[1:2, :]
    out_ref[...] = hu * s + c


def _tpu_tile_config():
    """Per-generation (MAX_TILE_BYTES, vmem_limit_bytes)."""
    try:
        kind = jax.devices()[0].device_kind.lower()
    except Exception:  # pragma: no cover - be robust to odd runtimes
        kind = ""
    if "v7" in kind:
        # 64 MiB physical VMEM per TC: 6 MiB tile * 4 (in+out double-buffered)
        # = 24 MiB, 48 MiB limit leaves headroom.
        return 6 * 1024 * 1024, 48 * 1024 * 1024
    if "v6" in kind:
        # 128 MiB physical: sit at the 85-86% HBM roofline plateau.
        return 8 * 1024 * 1024, 80 * 1024 * 1024
    if "v5 lite" in kind or "v5e" in kind or "v5litepod" in kind:
        return 4 * 1024 * 1024, 64 * 1024 * 1024
    # Unknown generation: conservative (fits every known VMEM size).
    return 4 * 1024 * 1024, 48 * 1024 * 1024


def user_mediator_fm(item_pop_embs, user_degree_embs, hu,
                     item_pop_prior, user_degree_prior, prior: bool):
    """Pallas implementation of UserMediatorFM.forward.

    item_pop_embs:     [Gi, D] float32
    user_degree_embs:  [Gu, D] float32
    hu:                [B,  D] float32
    item_pop_prior:    [Gi] or [Gi, 1] float32
    user_degree_prior: [Gu] or [Gu, 1] float32
    prior:             python bool (static) — use given priors or uniform 1/G.
    Returns mediator_emb: [B, D] float32
    """
    item_pop_embs = item_pop_embs.astype(jnp.float32)
    user_degree_embs = user_degree_embs.astype(jnp.float32)
    hu = hu.astype(jnp.float32)

    Gi, D = item_pop_embs.shape
    Gu, _ = user_degree_embs.shape
    B, _ = hu.shape

    # ---- batch-independent part, hoisted out of the kernel (tiny) ----------
    if prior:
        ip = item_pop_prior.astype(jnp.float32).reshape(Gi, 1)
        up = user_degree_prior.astype(jnp.float32).reshape(Gu, 1)
    else:
        ip = jnp.full((Gi, 1), 1.0 / Gi, dtype=jnp.float32)
        up = jnp.full((Gu, 1), 1.0 / Gu, dtype=jnp.float32)

    wi = item_pop_embs * ip                                   # [Gi, D]
    wu = user_degree_embs * up                                # [Gu, D]
    s_const = (jnp.sum(wi, axis=0, keepdims=True)
               + jnp.sum(wu, axis=0, keepdims=True))          # [1, D]
    ss_const = (jnp.sum(wi * wi, axis=0, keepdims=True)
                + jnp.sum(wu * wu, axis=0, keepdims=True))    # [1, D]
    # out = 0.5*((hu+s)^2 - (hu^2+ss)) == hu*s + 0.5*(s^2 - ss)
    c_const = 0.5 * (s_const * s_const - ss_const)            # [1, D]

    # ---- lane-dense packing: make the last dim a multiple of 128 -----------
    LANE = 128
    pack = 1 if D % LANE == 0 else math.lcm(D, LANE) // D
    Dp = D * pack

    # ---- tile sizing: grow to the byte budget, balanced across tiles -------
    MAX_TILE_BYTES, VMEM_LIMIT = _tpu_tile_config()
    row_bytes = Dp * 4
    tb_budget = max(8, (MAX_TILE_BYTES // row_bytes) // 8 * 8)

    rows_packed = -(-B // pack)                         # ceil(B / pack)
    ntiles = max(1, -(-rows_packed // tb_budget))
    # v7x has 2 TensorCores: make sure the 'parallel' grid has >= 2 steps so
    # both engage (harmless / measured-neutral on v5e & v6e).
    if ntiles < 2 and rows_packed > 8:
        ntiles = 2
    TB = -(-rows_packed // ntiles)
    TB = -(-TB // 8) * 8                                # sublane multiple
    rows_padded = ntiles * TB
    total_rows = rows_padded * pack

    # Padding is now at most a few sublane rows per tile (not a full tile's
    # worth), so the pad copy + final slice are negligible on ragged batches.
    # TODO(synk): a scalar-prefetch row-count + masked tail store could remove
    # the pad copy entirely; skipped — padding traffic is already tiny.
    if total_rows != B:
        hu_pad = jnp.pad(hu, ((0, total_rows - B), (0, 0)))
    else:
        hu_pad = hu
    hu_packed = hu_pad.reshape(rows_padded, Dp)         # [Bp, Dp]

    # Stack the two resident constants into a single [2, Dp] operand.
    consts = jnp.concatenate(
        [jnp.tile(s_const, (1, pack)), jnp.tile(c_const, (1, pack))], axis=0)

    grid = (rows_padded // TB,)

    out_packed = pl.pallas_call(
        _fm_kernel,
        out_shape=jax.ShapeDtypeStruct((rows_padded, Dp), jnp.float32),
        grid=grid,
        in_specs=[
            pl.BlockSpec((TB, Dp), lambda i: (i, 0)),   # streamed hu tile
            pl.BlockSpec((2, Dp), lambda i: (0, 0)),    # resident constants
        ],
        out_specs=pl.BlockSpec((TB, Dp), lambda i: (i, 0)),
        compiler_params=pltpu.CompilerParams(
            dimension_semantics=("parallel",),
            vmem_limit_bytes=VMEM_LIMIT,
        ),
    )(hu_packed, consts)

    return out_packed.reshape(total_rows, D)[:B]


def _reference(item_pop_embs, user_degree_embs, hu,
               item_pop_prior, user_degree_prior, prior):
    # Pure-JAX reference mirroring the PyTorch forward exactly.
    if prior:
        wi = item_pop_embs * item_pop_prior
        wu = user_degree_embs * user_degree_prior
    else:
        wi = item_pop_embs * (1.0 / item_pop_embs.shape[0])
        wu = user_degree_embs * (1.0 / user_degree_embs.shape[0])
    B = hu.shape[0]
    wi_rep = jnp.broadcast_to(wi[None, :, :], (B, wi.shape[0], hu.shape[1]))
    wu_rep = jnp.broadcast_to(wu[None, :, :], (B, wu.shape[0], hu.shape[1]))
    conf = jnp.concatenate([hu[:, None, :], wi_rep, wu_rep], axis=1)
    sum_sqr = jnp.sum(conf, axis=1) ** 2
    sqr_sum = jnp.sum(conf ** 2, axis=1)
    return 0.5 * (sum_sqr - sqr_sum)


if __name__ == "__main__":
    key = jax.random.PRNGKey(0)
    k1, k2, k3, k4, k5 = jax.random.split(key, 5)

    edim = 32        # embedding dim
    B = 8            # number of users (len(hu))
    Gi = 4           # item popularity groups
    Gu = 5           # user degree groups

    item_pop_embs = jax.random.normal(k1, (Gi, edim), dtype=jnp.float32)
    user_degree_embs = jax.random.normal(k2, (Gu, edim), dtype=jnp.float32)
    hu = jax.random.normal(k3, (B, edim), dtype=jnp.float32)
    item_pop_prior = jax.nn.softmax(
        jax.random.normal(k4, (Gi,)), axis=0).reshape(Gi, 1)
    user_degree_prior = jax.nn.softmax(
        jax.random.normal(k5, (Gu,)), axis=0).reshape(Gu, 1)

    # prior=True path
    out_p = user_mediator_fm(item_pop_embs, user_degree_embs, hu,
                             item_pop_prior, user_degree_prior, prior=True)
    jax.block_until_ready(out_p)
    ref_p = _reference(item_pop_embs, user_degree_embs, hu,
                       item_pop_prior, user_degree_prior, prior=True)
    assert out_p.shape == (B, edim)
    assert jnp.allclose(out_p, ref_p, atol=1e-4, rtol=1e-4)

    # prior=False path (uniform 1/G priors)
    out_u = user_mediator_fm(item_pop_embs, user_degree_embs, hu,
                             item_pop_prior, user_degree_prior, prior=False)
    jax.block_until_ready(out_u)
    ref_u = _reference(item_pop_embs, user_degree_embs, hu,
                       item_pop_prior, user_degree_prior, prior=False)
    assert jnp.allclose(out_u, ref_u, atol=1e-4, rtol=1e-4)

    # Larger ragged batch: exercises packing, balanced tiling, tail padding,
    # and a multi-step parallel grid.
    k6, k7 = jax.random.split(k5)
    B2, D2 = 4100, 32
    hu2 = jax.random.normal(k6, (B2, D2), dtype=jnp.float32)
    out2 = user_mediator_fm(item_pop_embs, user_degree_embs, hu2,
                            item_pop_prior, user_degree_prior, prior=True)
    jax.block_until_ready(out2)
    ref2 = _reference(item_pop_embs, user_degree_embs, hu2,
                      item_pop_prior, user_degree_prior, prior=True)
    assert out2.shape == (B2, D2)
    assert jnp.allclose(out2, ref2, atol=1e-4, rtol=1e-4)

    # D already a multiple of 128 (pack == 1 path).
    D3 = 128
    ie3 = jax.random.normal(k1, (Gi, D3), dtype=jnp.float32)
    ue3 = jax.random.normal(k2, (Gu, D3), dtype=jnp.float32)
    hu3 = jax.random.normal(k7, (257, D3), dtype=jnp.float32)
    out3 = user_mediator_fm(ie3, ue3, hu3,
                            item_pop_prior, user_degree_prior, prior=True)
    jax.block_until_ready(out3)
    ref3 = _reference(ie3, ue3, hu3,
                      item_pop_prior, user_degree_prior, prior=True)
    assert jnp.allclose(out3, ref3, atol=1e-4, rtol=1e-4)

    print("KERNEL_OK")
</pallas_src>

<mosaic_0001>
module attributes {stable_mosaic.version = 11 : i64} {
  func.func @_fm_kernel(%arg0: i32, %arg1: memref<8x128xf32, #tpu.memory_space<vmem>>, %arg2: memref<2x128xf32, #tpu.memory_space<vmem>>, %arg3: memref<8x128xf32, #tpu.memory_space<vmem>>) attributes {dimension_semantics = [#tpu.dimension_semantics<parallel>], iteration_bounds = array<i64: 1>, scalar_prefetch = 0 : i64, scratch_operands = 0 : i64, tpu.core_type = #tpu.core_type<tc>, window_params = [{transform_indices = @transform_0, window_bounds = array<i64: 8, 128>}, {pipeline_mode = #tpu.pipeline_mode<synchronous>, transform_indices = @transform_1, window_bounds = array<i64: 2, 128>}, {transform_indices = @transform_2, window_bounds = array<i64: 8, 128>}]} {
    %c0 = arith.constant 0 : index
    %c0_0 = arith.constant 0 : index
    %0 = vector.load %arg1[%c0, %c0_0] : memref<8x128xf32, #tpu.memory_space<vmem>>, vector<8x128xf32>
    %c0_1 = arith.constant 0 : index
    %c0_2 = arith.constant 0 : index
    %1 = vector.load %arg2[%c0_1, %c0_2] : memref<2x128xf32, #tpu.memory_space<vmem>>, vector<1x128xf32>
    %c1 = arith.constant 1 : index
    %c0_3 = arith.constant 0 : index
    %2 = vector.load %arg2[%c1, %c0_3] : memref<2x128xf32, #tpu.memory_space<vmem>>, vector<1x128xf32>
    %3 = vector.broadcast %1 : vector<1x128xf32> to vector<8x128xf32>
    %4 = arith.mulf %0, %3 : vector<8x128xf32>
    %5 = vector.broadcast %2 : vector<1x128xf32> to vector<8x128xf32>
    %6 = arith.addf %4, %5 : vector<8x128xf32>
    %c0_4 = arith.constant 0 : index
    %c0_5 = arith.constant 0 : index
    %7 = vector.load %arg3[%c0_4, %c0_5] : memref<8x128xf32, #tpu.memory_space<vmem>>, vector<8x128xf32>
    tpu.vector_store %arg3[%c0_4, %c0_5], %6 {strides = array<i32>} : memref<8x128xf32, #tpu.memory_space<vmem>>, vector<8x128xf32>,
    return
  }
  func.func @transform_0(%arg0: i32) -> (i32, i32) {
    %c0_i32 = arith.constant 0 : i32
    %c0_i32_0 = arith.constant 0 : i32
    return %arg0, %c0_i32 : i32, i32
  }
  func.func @transform_1(%arg0: i32) -> (i32, i32) {
    %c0_i32 = arith.constant 0 : i32
    %c0_i32_0 = arith.constant 0 : i32
    %c0_i32_1 = arith.constant 0 : i32
    return %c0_i32, %c0_i32_0 : i32, i32
  }
  func.func @transform_2(%arg0: i32) -> (i32, i32) {
    %c0_i32 = arith.constant 0 : i32
    %c0_i32_0 = arith.constant 0 : i32
    return %arg0, %c0_i32 : i32, i32
  }
}

</mosaic_0001>

<bundles_post_ra>
// kernel: tpu_custom_call.1
= control target key start
LH: loop header
LB: loop body
LE: loop exit
PB: predicated region body
PF: predicated region fallthrough
CT: control target
= control target key end

     0   :  { %7 = vsyncpa [#allocation3], 0  ;;  %s152_s0 = inlined_call_operand.hbm [shape: f32[8,128], index: 0, kind: input, shape index: {}]   ;;  %s153_s1 = inlined_call_operand.vmem [shape: f32[2,128], index: 1, kind: input, shape index: {}]   ;;  %s154_s2 = inlined_call_operand.hbm [shape: f32[8,128], index: 2, kind: output, shape index: {}]  }
   0x1   :  { %8 = vsyncpa [#allocation4], 0  ;;  %s105_s9 = smov [#allocation2]   ;;  %s57_s13 = scalar_lea.hbm %s152_s0, 128 }
   0x2   :  { %s15_s10 = sshll.u32 %s105_s9, 4  ;;  %p58_p0 = scmp.ne.s32.totalorder %s152_s0, %s57_s13  ;;  %s16_s10 = int_to_ptr.vmem [resolvable:$true] %s15_s10 }
   0x3   :  { %p61_p1 = scmp.lt.u32.totalorder %s57_s13, %s152_s0 }
   0x5   :  { %p63_p2 = pnand %p61_p1, %p58_p0 }
   0x7   :  { %66 = shalt.err (!%p63_p2)
}
   0x8   :  { %s67_s18 = scalar_lea.vmem %s16_s10, 128  ;;  %p72_p4 = scmp.lt.s32.totalorder %s16_s10, %s16_s10 }
   0x9   :  { %p68_p3 = scmp.ne.s32.totalorder %s16_s10, %s67_s18  ;;  %p73_p5 = scmp.lt.s32.totalorder %s67_s18, %s67_s18 }
   0xb   :  { %p74_p6 = por %p73_p5, %p72_p4 }
   0xd   :  { %p75_p7 = pnand %p74_p6, %p68_p3 }
   0xf   :  { %78 = shalt.err (!%p75_p7)
}
  0x10   :  { %18 = dma.hbm_to_vmem [thread:$0]  %s152_s0, 128, %s16_s10, [#allocation3]  }
  0x11   :  { %101 = dma.done.wait [#allocation3], 128  }
  0x12   :  { %102 = vsyncadd [#allocation3], 4294967168  ;;  %v24_v0 = vld [vmem:[#allocation2] sm:$0xff]  ;;  %s106_s25 = smov [#allocation5]  }
  0x13   :  { %v53_v1 = vld [vmem:[%s153_s1] ss:$0 sm:$0xff]  ;;  %v54_v2 = vld [vmem:[%s153_s1 + $0x1] ss:$0 sm:$0xff]  ;;  %s44_s26 = sshll.u32 %s106_s25, 4  ;;  %s45_s26 = int_to_ptr.vmem [resolvable:$true] %s44_s26 }
  0x14   :  { %v31_v3 = vmul.f32 %v53_v1, %v24_v0  ;;  %s79_s27 = scalar_lea.vmem %s45_s26, 128  ;;  %p84_p9 = scmp.lt.s32.totalorder %s45_s26, %s45_s26 }
  0x15   :  { %p80_p8 = scmp.ne.s32.totalorder %s45_s26, %s79_s27  ;;  %p85_p10 = scmp.lt.s32.totalorder %s79_s27, %s79_s27 }
  0x16   :  { %v36_v4 = vadd.f32 %v54_v2, %v31_v3 }
  0x17   :  { %p86_p11 = por %p85_p10, %p84_p9 }
  0x18   :  { %37 = vst [vmem:[#allocation5] sm:$0xff] %v36_v4 }
  0x19   :  { %p87_p12 = pnand %p86_p11, %p80_p8 }
  0x1b   :  { %90 = shalt.err (!%p87_p12)
}
  0x1c   :  { %s91_s29 = scalar_lea.hbm %s154_s2, 128 }
  0x1d   :  { %p92_p13 = scmp.ne.s32.totalorder %s154_s2, %s91_s29  ;;  %p95_p0 = scmp.lt.u32.totalorder %s91_s29, %s154_s2 }
  0x1f   :  { %p97_p1 = pnand %p95_p0, %p92_p13 }
  0x21   :  { %100 = shalt.err (!%p97_p1)
}
  0x22   :  { %47 = dma.vmem_to_hbm [thread:$0]  %s45_s26, 128, %s154_s2, [#allocation4]  }
  0x23   :  { %103 = dma.done.wait [#allocation4], 128  }
  0x24   :  { %104 = vsyncadd [#allocation4], 4294967168 }
  0x25   :  { %51 = vsyncpa [#allocation3], 1 }
  0x26   :  { %52 = vsyncpa [#allocation4], 1 }

</bundles_post_ra>
